<compile_context>
chip_gen: v6e
topology: v6e:2x2x1
jax: 0.10.0
libtpu: 0.0.40
codegen_flags: <defaults>
</compile_context>

<pallas_src>
import functools

import jax
import jax.numpy as jnp
import numpy as np
from jax.experimental import pallas as pl
from jax.experimental.pallas import tpu as pltpu


# ---------------------------------------------------------------------------
# Kernel: one lane-dense (C, Wd = Bt*L) tile (Bt samples) per grid step.
# ---------------------------------------------------------------------------
def _resblock_kernel(x_ref, film_ref, w1_ref, b1_ref, w2_ref, b2_ref,
                     n1w_ref, n1b_ref, n2w_ref, n2b_ref,
                     gm_ref, gmt_ref, s_ref, st_ref, ml_ref, mr_ref, o_ref,
                     *, inv_n, eps):
    f32 = jnp.float32
    bf16 = jnp.bfloat16

    x = x_ref[...].astype(f32)                     # (C, Wd)
    C, Wd = x.shape

    gm, gmt = gm_ref[...], gmt_ref[...]            # (G, C) / (C, G)
    S, St = s_ref[...], st_ref[...]                # (Wd, Bt) / (Bt, Wd)
    ml, mr = ml_ref[...], mr_ref[...]              # (1, Wd) conv boundary masks

    def group_norm(h, w, bias):
        # Fused stats: E[x] and E[x^2] via two independent Wd-wide reduces;
        # variance = E[x^2] - mean^2; scale/shift folded before one broadcast
        # each (no d = h - mean temp, no serialized reduce->broadcast chain).
        ch_sum = jnp.dot(h, S, preferred_element_type=f32)                  # (C, Bt)
        sq_sum = jnp.dot(h * h, S, preferred_element_type=f32)              # (C, Bt)
        mean = jnp.dot(gmt, jnp.dot(gm, ch_sum, preferred_element_type=f32),
                       preferred_element_type=f32) * inv_n                  # (C, Bt)
        ex2 = jnp.dot(gmt, jnp.dot(gm, sq_sum, preferred_element_type=f32),
                      preferred_element_type=f32) * inv_n                   # (C, Bt)
        var = jnp.maximum(ex2 - mean * mean, 0.0)
        scale = jax.lax.rsqrt(var + eps) * w                                # (C, Bt)
        shift = bias - mean * scale                                         # (C, Bt)
        return (h * jnp.dot(scale, St, preferred_element_type=f32)
                + jnp.dot(shift, St, preferred_element_type=f32))

    def gelu(h):
        # tanh-form GELU: transcendental runs on the EUP instead of the VALU.
        c = 0.7978845608028654  # sqrt(2/pi)
        return 0.5 * h * (1.0 + jnp.tanh(c * (h + 0.044715 * h * h * h)))

    def conv3(h, w_ref, b_ref):
        # 'same' conv, kernel=3, padding=1: three accumulating bf16 MXU dots
        # (no (3C, Wd) concat buffer).  Masks zero cross-sample wraparound.
        h_m1 = (pltpu.roll(h, 1, axis=1) * ml).astype(bf16)
        h_p1 = (pltpu.roll(h, Wd - 1, axis=1) * mr).astype(bf16)
        hc = h.astype(bf16)
        acc = jnp.dot(w_ref[0], h_m1, preferred_element_type=f32)
        acc = acc + jnp.dot(w_ref[1], hc, preferred_element_type=f32)
        acc = acc + jnp.dot(w_ref[2], h_p1, preferred_element_type=f32)
        return acc + b_ref[...]

    # --- branch 1: conv1(GELU(norm1(x)))
    h = conv3(gelu(group_norm(x, n1w_ref[...], n1b_ref[...])), w1_ref, b1_ref)

    # --- FiLM: per-block (2, C, Bt) table, broadcast to lanes via St (K = Bt).
    g = jnp.dot(film_ref[0], St, preferred_element_type=f32)                # (C, Wd)
    b = jnp.dot(film_ref[1], St, preferred_element_type=f32)                # (C, Wd)
    h = h * (1.0 + g) + b

    # --- branch 2: conv2(GELU(norm2(h)))
    h = conv3(gelu(group_norm(h, n2w_ref[...], n2b_ref[...])), w2_ref, b2_ref)

    # Residual (lengths identical with 'same' padding).  Re-read x_ref so the
    # f32 copy of x is not live across both branches.
    o_ref[...] = (x_ref[...].astype(f32) + h).astype(o_ref.dtype)


# ---------------------------------------------------------------------------
# Helpers: generation query, constant BlockSpecs, VMEM-aware batch tiling.
# ---------------------------------------------------------------------------
def _device_kind():
    try:
        return jax.devices()[0].device_kind.lower()
    except Exception:
        return ""


def _const_spec(shape):
    # Constant operands: block index never changes, so single-buffer them to
    # halve their VMEM footprint (guarded for older jax without pl.Buffered).
    ndim = len(shape)
    idx = lambda i, _n=ndim: (0,) * _n
    if hasattr(pl, "Buffered"):
        try:
            return pl.BlockSpec(shape, idx, pipeline_mode=pl.Buffered(1))
        except TypeError:
            pass
    return pl.BlockSpec(shape, idx)


def _pick_batch_tile(B, L, C, x_itemsize, budget_bytes):
    """Largest lane-dense batch tile whose working set fits the VMEM budget,
    preferring >=2 grid steps (v7x megacore) when the batch allows it."""
    def est(bt):
        wd = bt * L
        slabs = 8 * C * wd * 4                  # live f32 working slabs (high-water)
        io = 2 * 2 * C * wd * x_itemsize        # double-buffered x / out tiles
        aux = 2 * wd * bt * 4 + 2 * wd * 4      # S/St + boundary masks
        return slabs + io + aux

    cands = [bt for bt in range(1, B + 1)
             if B % bt == 0 and (bt == B or (bt * L) % 128 == 0)]
    fits = [bt for bt in cands if est(bt) <= budget_bytes]
    if not fits:
        # TODO(synk): tile along L with a 1-element halo when even the smallest
        # legal batch tile exceeds the VMEM budget (very long L, L % 128 != 0).
        return min(cands, key=lambda bt: bt * L)
    dense = [bt for bt in fits if bt * L >= 512] or fits
    multi = [bt for bt in dense if B // bt >= 2]
    return max(multi or dense, key=lambda bt: bt * L)


# ---------------------------------------------------------------------------
# Wrapper
# ---------------------------------------------------------------------------
def res_block_1d_pallas(x, temb, p, *, groups=8, eps=1e-5):
    B, C, L = x.shape
    G = groups
    assert C % G == 0, "channels must be divisible by groups"
    cg = C // G
    f32 = jnp.float32
    bf16 = jnp.bfloat16

    is_v7x = "v7" in _device_kind()
    vmem_limit = (48 if is_v7x else 64) * 1024 * 1024
    Bt = _pick_batch_tile(B, L, C, jnp.dtype(x.dtype).itemsize,
                          int(vmem_limit * 0.75))
    Wd = Bt * L
    steps = B // Bt

    # Lane-dense activation slab (layout plumbing only; cast happens in-kernel).
    x2d = jnp.transpose(x, (1, 0, 2)).reshape(C, B * L)

    # FiLM projection hoisted out of the kernel, re-laid-out per grid step:
    # (steps, 2, C, Bt) so each step DMAs only its own tiny slice.
    film = (jnp.dot(temb.astype(f32), jnp.transpose(p["fc_w"]).astype(f32),
                    precision=jax.lax.Precision.HIGHEST)
            + p["fc_b"].astype(f32))                                   # (B, 2C)
    g_tab = film[:, :C].reshape(steps, Bt, C).transpose(0, 2, 1)       # (steps, C, Bt)
    b_tab = film[:, C:].reshape(steps, Bt, C).transpose(0, 2, 1)
    film_steps = jnp.stack([g_tab, b_tab], axis=1)                     # (steps, 2, C, Bt)

    # Conv weights: (Cout, Cin, 3) -> (3, Cout, Cin), bf16 for the MXU.
    w1 = jnp.transpose(p["c1_w"], (2, 0, 1)).astype(bf16)
    w2 = jnp.transpose(p["c2_w"], (2, 0, 1)).astype(bf16)

    # Constant aggregation matrices and conv boundary masks (identical for
    # every grid step since block starts are multiples of L).
    gm = (np.arange(G)[:, None] == (np.arange(C)[None, :] // cg)).astype(np.float32)  # (G, C)
    S = ((np.arange(Wd)[:, None] // L) == np.arange(Bt)[None, :]).astype(np.float32)  # (Wd, Bt)
    pos = np.arange(Wd) % L
    m_left = (pos >= 1).astype(np.float32)[None, :]                    # (1, Wd)
    m_right = (pos <= L - 2).astype(np.float32)[None, :]

    args = (
        x2d,                                           # original dtype; cast in kernel
        film_steps,
        w1, p["c1_b"].reshape(C, 1).astype(f32),
        w2, p["c2_b"].reshape(C, 1).astype(f32),
        p["n1_w"].reshape(C, 1).astype(f32), p["n1_b"].reshape(C, 1).astype(f32),
        p["n2_w"].reshape(C, 1).astype(f32), p["n2_b"].reshape(C, 1).astype(f32),
        jnp.asarray(gm), jnp.asarray(gm.T),
        jnp.asarray(S), jnp.asarray(S.T),
        jnp.asarray(m_left), jnp.asarray(m_right),
    )

    kernel = functools.partial(_resblock_kernel,
                               inv_n=1.0 / float(cg * L), eps=float(eps))

    in_specs = [
        pl.BlockSpec((C, Wd), lambda i: (0, i)),             # x slab, lane-tiled
        pl.BlockSpec((None, 2, C, Bt), lambda i: (i, 0, 0, 0)),  # per-step FiLM slice
        _const_spec((3, C, C)), _const_spec((C, 1)),         # conv1 w (bf16), b
        _const_spec((3, C, C)), _const_spec((C, 1)),         # conv2 w (bf16), b
        _const_spec((C, 1)), _const_spec((C, 1)),            # norm1 w, b
        _const_spec((C, 1)), _const_spec((C, 1)),            # norm2 w, b
        _const_spec((G, C)), _const_spec((C, G)),            # group aggregation
        _const_spec((Wd, Bt)), _const_spec((Bt, Wd)),        # sample reduce / broadcast
        _const_spec((1, Wd)), _const_spec((1, Wd)),          # conv boundary masks
    ]

    out2d = pl.pallas_call(
        kernel,
        out_shape=jax.ShapeDtypeStruct((C, B * L), x.dtype),
        grid=(steps,),
        in_specs=in_specs,
        out_specs=pl.BlockSpec((C, Wd), lambda i: (0, i)),
        compiler_params=pltpu.CompilerParams(
            dimension_semantics=("parallel",),
            vmem_limit_bytes=vmem_limit),
    )(*args)

    return jnp.transpose(out2d.reshape(C, B, L), (1, 0, 2))


# ---------------------------------------------------------------------------
# Pure-JAX reference (mirrors the PyTorch forward: exact-erf GELU, f32 convs)
# ---------------------------------------------------------------------------
def res_block_1d_ref(x, temb, p, *, groups=8, eps=1e-5):
    def gn(h, w, b):
        B, C, L = h.shape
        hg = h.reshape(B, groups, C // groups, L)
        m = hg.mean(axis=(2, 3), keepdims=True)
        v = ((hg - m) ** 2).mean(axis=(2, 3), keepdims=True)
        hn = ((hg - m) / jnp.sqrt(v + eps)).reshape(B, C, L)
        return hn * w[None, :, None] + b[None, :, None]

    def gelu(h):
        return 0.5 * h * (1.0 + jax.lax.erf(h / jnp.sqrt(jnp.float32(2.0))))

    def conv(h, w, b):
        out = jax.lax.conv_general_dilated(
            h, w, window_strides=(1,), padding=((1, 1),),
            dimension_numbers=("NCH", "OIH", "NCH"),
            precision=jax.lax.Precision.HIGHEST)
        return out + b[None, :, None]

    C = x.shape[1]
    h = conv(gelu(gn(x, p["n1_w"], p["n1_b"])), p["c1_w"], p["c1_b"])
    film = jnp.dot(temb, p["fc_w"].T, precision=jax.lax.Precision.HIGHEST) + p["fc_b"]
    g, bb = film[:, :C], film[:, C:]
    h = h * (1.0 + g[:, :, None]) + bb[:, :, None]
    h = conv(gelu(gn(h, p["n2_w"], p["n2_b"])), p["c2_w"], p["c2_b"])
    return x + h


if __name__ == "__main__":
    B, C, L, E, K, G = 2, 16, 16, 32, 3, 8

    key = jax.random.PRNGKey(0)
    ks = jax.random.split(key, 12)
    params = {
        "c1_w": jax.random.normal(ks[0], (C, C, K), jnp.float32) * 0.1,
        "c1_b": jax.random.normal(ks[1], (C,), jnp.float32) * 0.1,
        "c2_w": jax.random.normal(ks[2], (C, C, K), jnp.float32) * 0.1,
        "c2_b": jax.random.normal(ks[3], (C,), jnp.float32) * 0.1,
        "n1_w": 1.0 + jax.random.normal(ks[4], (C,), jnp.float32) * 0.05,
        "n1_b": jax.random.normal(ks[5], (C,), jnp.float32) * 0.05,
        "n2_w": 1.0 + jax.random.normal(ks[6], (C,), jnp.float32) * 0.05,
        "n2_b": jax.random.normal(ks[7], (C,), jnp.float32) * 0.05,
        "fc_w": jax.random.normal(ks[8], (2 * C, E), jnp.float32) * 0.1,
        "fc_b": jax.random.normal(ks[9], (2 * C,), jnp.float32) * 0.1,
    }
    x = jax.random.normal(ks[10], (B, C, L), jnp.float32)
    temb = jax.random.normal(ks[11], (B, E), jnp.float32)

    out = jax.block_until_ready(res_block_1d_pallas(x, temb, params, groups=G))
    ref = jax.block_until_ready(res_block_1d_ref(x, temb, params, groups=G))

    max_diff = float(jnp.max(jnp.abs(out - ref)))
    assert out.shape == (B, C, L)
    # Tolerance covers bf16 MXU conv matmuls, tanh-form GELU vs exact erf, and
    # the E[x^2]-mean^2 GroupNorm variance vs the HIGHEST-precision reference.
    assert max_diff < 3e-2, f"mismatch vs reference, max abs diff = {max_diff}"

    print("KERNEL_OK")
</pallas_src>

<mosaic_0001>
module attributes {stable_mosaic.version = 11 : i64} {
  func.func @_resblock_kernel(%arg0: i32, %arg1: memref<16x32xf32, #tpu.memory_space<vmem>>, %arg2: memref<1x2x16x2xf32, #tpu.memory_space<vmem>>, %arg3: memref<3x16x16xbf16, #tpu.memory_space<vmem>>, %arg4: memref<16x1xf32, #tpu.memory_space<vmem>>, %arg5: memref<3x16x16xbf16, #tpu.memory_space<vmem>>, %arg6: memref<16x1xf32, #tpu.memory_space<vmem>>, %arg7: memref<16x1xf32, #tpu.memory_space<vmem>>, %arg8: memref<16x1xf32, #tpu.memory_space<vmem>>, %arg9: memref<16x1xf32, #tpu.memory_space<vmem>>, %arg10: memref<16x1xf32, #tpu.memory_space<vmem>>, %arg11: memref<8x16xf32, #tpu.memory_space<vmem>>, %arg12: memref<16x8xf32, #tpu.memory_space<vmem>>, %arg13: memref<32x2xf32, #tpu.memory_space<vmem>>, %arg14: memref<2x32xf32, #tpu.memory_space<vmem>>, %arg15: memref<1x32xf32, #tpu.memory_space<vmem>>, %arg16: memref<1x32xf32, #tpu.memory_space<vmem>>, %arg17: memref<16x32xf32, #tpu.memory_space<vmem>>) attributes {dimension_semantics = [#tpu.dimension_semantics<parallel>], iteration_bounds = array<i64: 1>, scalar_prefetch = 0 : i64, scratch_operands = 0 : i64, tpu.core_type = #tpu.core_type<tc>, window_params = [{transform_indices = @transform_0, window_bounds = array<i64: 16, 32>}, {transform_indices = @transform_1, window_bounds = array<i64: 1, 2, 16, 2>}, {pipeline_mode = #tpu.pipeline_mode<synchronous>, transform_indices = @transform_2, window_bounds = array<i64: 3, 16, 16>}, {pipeline_mode = #tpu.pipeline_mode<synchronous>, transform_indices = @transform_3, window_bounds = array<i64: 16, 1>}, {pipeline_mode = #tpu.pipeline_mode<synchronous>, transform_indices = @transform_4, window_bounds = array<i64: 3, 16, 16>}, {pipeline_mode = #tpu.pipeline_mode<synchronous>, transform_indices = @transform_5, window_bounds = array<i64: 16, 1>}, {pipeline_mode = #tpu.pipeline_mode<synchronous>, transform_indices = @transform_6, window_bounds = array<i64: 16, 1>}, {pipeline_mode = #tpu.pipeline_mode<synchronous>, transform_indices = @transform_7, window_bounds = array<i64: 16, 1>}, {pipeline_mode = #tpu.pipeline_mode<synchronous>, transform_indices = @transform_8, window_bounds = array<i64: 16, 1>}, {pipeline_mode = #tpu.pipeline_mode<synchronous>, transform_indices = @transform_9, window_bounds = array<i64: 16, 1>}, {pipeline_mode = #tpu.pipeline_mode<synchronous>, transform_indices = @transform_10, window_bounds = array<i64: 8, 16>}, {pipeline_mode = #tpu.pipeline_mode<synchronous>, transform_indices = @transform_11, window_bounds = array<i64: 16, 8>}, {pipeline_mode = #tpu.pipeline_mode<synchronous>, transform_indices = @transform_12, window_bounds = array<i64: 32, 2>}, {pipeline_mode = #tpu.pipeline_mode<synchronous>, transform_indices = @transform_13, window_bounds = array<i64: 2, 32>}, {pipeline_mode = #tpu.pipeline_mode<synchronous>, transform_indices = @transform_14, window_bounds = array<i64: 1, 32>}, {pipeline_mode = #tpu.pipeline_mode<synchronous>, transform_indices = @transform_15, window_bounds = array<i64: 1, 32>}, {transform_indices = @transform_16, window_bounds = array<i64: 16, 32>}]} {
    %c0 = arith.constant 0 : index
    %c0_0 = arith.constant 0 : index
    %0 = vector.load %arg1[%c0, %c0_0] : memref<16x32xf32, #tpu.memory_space<vmem>>, vector<16x32xf32>
    %c0_1 = arith.constant 0 : index
    %c0_2 = arith.constant 0 : index
    %1 = vector.load %arg11[%c0_1, %c0_2] : memref<8x16xf32, #tpu.memory_space<vmem>>, vector<8x16xf32>
    %c0_3 = arith.constant 0 : index
    %c0_4 = arith.constant 0 : index
    %2 = vector.load %arg12[%c0_3, %c0_4] : memref<16x8xf32, #tpu.memory_space<vmem>>, vector<16x8xf32>
    %c0_5 = arith.constant 0 : index
    %c0_6 = arith.constant 0 : index
    %3 = vector.load %arg13[%c0_5, %c0_6] : memref<32x2xf32, #tpu.memory_space<vmem>>, vector<32x2xf32>
    %c0_7 = arith.constant 0 : index
    %c0_8 = arith.constant 0 : index
    %4 = vector.load %arg14[%c0_7, %c0_8] : memref<2x32xf32, #tpu.memory_space<vmem>>, vector<2x32xf32>
    %c0_9 = arith.constant 0 : index
    %c0_10 = arith.constant 0 : index
    %5 = vector.load %arg15[%c0_9, %c0_10] : memref<1x32xf32, #tpu.memory_space<vmem>>, vector<1x32xf32>
    %c0_11 = arith.constant 0 : index
    %c0_12 = arith.constant 0 : index
    %6 = vector.load %arg16[%c0_11, %c0_12] : memref<1x32xf32, #tpu.memory_space<vmem>>, vector<1x32xf32>
    %c0_13 = arith.constant 0 : index
    %c0_14 = arith.constant 0 : index
    %7 = vector.load %arg7[%c0_13, %c0_14] : memref<16x1xf32, #tpu.memory_space<vmem>>, vector<16x1xf32>
    %c0_15 = arith.constant 0 : index
    %c0_16 = arith.constant 0 : index
    %8 = vector.load %arg8[%c0_15, %c0_16] : memref<16x1xf32, #tpu.memory_space<vmem>>, vector<16x1xf32>
    %cst = arith.constant dense<0.000000e+00> : vector<16x2xf32>
    %9 = tpu.matmul %0, %3, %cst {dimension_numbers = #tpu.dot_dimension_numbers<[1], [0], [0], [1], [0, 0, 1, 1], [], []>} : vector<16x32xf32>, vector<32x2xf32>, vector<16x2xf32> -> vector<16x2xf32>
    %10 = arith.mulf %0, %0 : vector<16x32xf32>
    %cst_17 = arith.constant dense<0.000000e+00> : vector<16x2xf32>
    %11 = tpu.matmul %10, %3, %cst_17 {dimension_numbers = #tpu.dot_dimension_numbers<[1], [0], [0], [1], [0, 0, 1, 1], [], []>} : vector<16x32xf32>, vector<32x2xf32>, vector<16x2xf32> -> vector<16x2xf32>
    %cst_18 = arith.constant dense<0.000000e+00> : vector<8x2xf32>
    %12 = tpu.matmul %1, %9, %cst_18 {dimension_numbers = #tpu.dot_dimension_numbers<[1], [0], [0], [1], [0, 0, 1, 1], [], []>} : vector<8x16xf32>, vector<16x2xf32>, vector<8x2xf32> -> vector<8x2xf32>
    %cst_19 = arith.constant dense<0.000000e+00> : vector<16x2xf32>
    %13 = tpu.matmul %2, %12, %cst_19 {dimension_numbers = #tpu.dot_dimension_numbers<[1], [0], [0], [1], [0, 0, 1, 1], [], []>} : vector<16x8xf32>, vector<8x2xf32>, vector<16x2xf32> -> vector<16x2xf32>
    %cst_20 = arith.constant 3.125000e-02 : f32
    %14 = vector.broadcast %cst_20 : f32 to vector<16x2xf32>
    %15 = arith.mulf %13, %14 : vector<16x2xf32>
    %cst_21 = arith.constant dense<0.000000e+00> : vector<8x2xf32>
    %16 = tpu.matmul %1, %11, %cst_21 {dimension_numbers = #tpu.dot_dimension_numbers<[1], [0], [0], [1], [0, 0, 1, 1], [], []>} : vector<8x16xf32>, vector<16x2xf32>, vector<8x2xf32> -> vector<8x2xf32>
    %cst_22 = arith.constant dense<0.000000e+00> : vector<16x2xf32>
    %17 = tpu.matmul %2, %16, %cst_22 {dimension_numbers = #tpu.dot_dimension_numbers<[1], [0], [0], [1], [0, 0, 1, 1], [], []>} : vector<16x8xf32>, vector<8x2xf32>, vector<16x2xf32> -> vector<16x2xf32>
    %cst_23 = arith.constant 3.125000e-02 : f32
    %18 = vector.broadcast %cst_23 : f32 to vector<16x2xf32>
    %19 = arith.mulf %17, %18 : vector<16x2xf32>
    %20 = arith.mulf %15, %15 : vector<16x2xf32>
    %21 = arith.subf %19, %20 : vector<16x2xf32>
    %cst_24 = arith.constant 0.000000e+00 : f32
    %22 = vector.broadcast %cst_24 : f32 to vector<16x2xf32>
    %23 = arith.maximumf %21, %22 : vector<16x2xf32>
    %cst_25 = arith.constant 9.99999974E-6 : f32
    %24 = vector.broadcast %cst_25 : f32 to vector<16x2xf32>
    %25 = arith.addf %23, %24 : vector<16x2xf32>
    %26 = math.rsqrt %25 : vector<16x2xf32>
    %27 = vector.broadcast %7 : vector<16x1xf32> to vector<16x2xf32>
    %28 = arith.mulf %26, %27 : vector<16x2xf32>
    %29 = arith.mulf %15, %28 : vector<16x2xf32>
    %30 = vector.broadcast %8 : vector<16x1xf32> to vector<16x2xf32>
    %31 = arith.subf %30, %29 : vector<16x2xf32>
    %cst_26 = arith.constant dense<0.000000e+00> : vector<16x32xf32>
    %32 = tpu.matmul %28, %4, %cst_26 {dimension_numbers = #tpu.dot_dimension_numbers<[1], [0], [0], [1], [0, 0, 1, 1], [], []>} : vector<16x2xf32>, vector<2x32xf32>, vector<16x32xf32> -> vector<16x32xf32>
    %33 = arith.mulf %0, %32 : vector<16x32xf32>
    %cst_27 = arith.constant dense<0.000000e+00> : vector<16x32xf32>
    %34 = tpu.matmul %31, %4, %cst_27 {dimension_numbers = #tpu.dot_dimension_numbers<[1], [0], [0], [1], [0, 0, 1, 1], [], []>} : vector<16x2xf32>, vector<2x32xf32>, vector<16x32xf32> -> vector<16x32xf32>
    %35 = arith.addf %33, %34 : vector<16x32xf32>
    %cst_28 = arith.constant 5.000000e-01 : f32
    %36 = vector.broadcast %cst_28 : f32 to vector<16x32xf32>
    %37 = arith.mulf %36, %35 : vector<16x32xf32>
    %cst_29 = arith.constant 4.471500e-02 : f32
    %38 = vector.broadcast %cst_29 : f32 to vector<16x32xf32>
    %39 = arith.mulf %38, %35 : vector<16x32xf32>
    %40 = arith.mulf %39, %35 : vector<16x32xf32>
    %41 = arith.mulf %40, %35 : vector<16x32xf32>
    %42 = arith.addf %35, %41 : vector<16x32xf32>
    %cst_30 = arith.constant 0.797884583 : f32
    %43 = vector.broadcast %cst_30 : f32 to vector<16x32xf32>
    %44 = arith.mulf %43, %42 : vector<16x32xf32>
    %45 = math.tanh %44 : vector<16x32xf32>
    %cst_31 = arith.constant 1.000000e+00 : f32
    %46 = vector.broadcast %cst_31 : f32 to vector<16x32xf32>
    %47 = arith.addf %46, %45 : vector<16x32xf32>
    %48 = arith.mulf %37, %47 : vector<16x32xf32>
    %c1_i32 = arith.constant 1 : i32
    %49 = tpu.dynamic_rotate %48 by %c1_i32 dim 1 : vector<16x32xf32>, i32 -> vector<16x32xf32>
    %50 = vector.broadcast %5 : vector<1x32xf32> to vector<16x32xf32>
    %51 = arith.mulf %49, %50 : vector<16x32xf32>
    %52 = arith.truncf %51 : vector<16x32xf32> to vector<16x32xbf16>
    %c31_i32 = arith.constant 31 : i32
    %53 = tpu.dynamic_rotate %48 by %c31_i32 dim 1 : vector<16x32xf32>, i32 -> vector<16x32xf32>
    %54 = vector.broadcast %6 : vector<1x32xf32> to vector<16x32xf32>
    %55 = arith.mulf %53, %54 : vector<16x32xf32>
    %56 = arith.truncf %55 : vector<16x32xf32> to vector<16x32xbf16>
    %57 = arith.truncf %48 : vector<16x32xf32> to vector<16x32xbf16>
    %c0_32 = arith.constant 0 : index
    %c0_33 = arith.constant 0 : index
    %c0_34 = arith.constant 0 : index
    %58 = vector.load %arg3[%c0_32, %c0_33, %c0_34] : memref<3x16x16xbf16, #tpu.memory_space<vmem>>, vector<1x16x16xbf16>
    %59 = vector.shape_cast %58 : vector<1x16x16xbf16> to vector<16x16xbf16>
    %cst_35 = arith.constant dense<0.000000e+00> : vector<16x32xf32>
    %60 = tpu.matmul %59, %52, %cst_35 {dimension_numbers = #tpu.dot_dimension_numbers<[1], [0], [0], [1], [0, 0, 1, 1], [], []>} : vector<16x16xbf16>, vector<16x32xbf16>, vector<16x32xf32> -> vector<16x32xf32>
    %c1 = arith.constant 1 : index
    %c0_36 = arith.constant 0 : index
    %c0_37 = arith.constant 0 : index
    %61 = vector.load %arg3[%c1, %c0_36, %c0_37] : memref<3x16x16xbf16, #tpu.memory_space<vmem>>, vector<1x16x16xbf16>
    %62 = vector.shape_cast %61 : vector<1x16x16xbf16> to vector<16x16xbf16>
    %cst_38 = arith.constant dense<0.000000e+00> : vector<16x32xf32>
    %63 = tpu.matmul %62, %57, %cst_38 {dimension_numbers = #tpu.dot_dimension_numbers<[1], [0], [0], [1], [0, 0, 1, 1], [], []>} : vector<16x16xbf16>, vector<16x32xbf16>, vector<16x32xf32> -> vector<16x32xf32>
    %64 = arith.addf %60, %63 : vector<16x32xf32>
    %c2 = arith.constant 2 : index
    %c0_39 = arith.constant 0 : index
    %c0_40 = arith.constant 0 : index
    %65 = vector.load %arg3[%c2, %c0_39, %c0_40] : memref<3x16x16xbf16, #tpu.memory_space<vmem>>, vector<1x16x16xbf16>
    %66 = vector.shape_cast %65 : vector<1x16x16xbf16> to vector<16x16xbf16>
    %cst_41 = arith.constant dense<0.000000e+00> : vector<16x32xf32>
    %67 = tpu.matmul %66, %56, %cst_41 {dimension_numbers = #tpu.dot_dimension_numbers<[1], [0], [0], [1], [0, 0, 1, 1], [], []>} : vector<16x16xbf16>, vector<16x32xbf16>, vector<16x32xf32> -> vector<16x32xf32>
    %68 = arith.addf %64, %67 : vector<16x32xf32>
    %c0_42 = arith.constant 0 : index
    %c0_43 = arith.constant 0 : index
    %69 = vector.load %arg4[%c0_42, %c0_43] : memref<16x1xf32, #tpu.memory_space<vmem>>, vector<16x1xf32>
    %70 = vector.broadcast %69 : vector<16x1xf32> to vector<16x32xf32>
    %71 = arith.addf %68, %70 : vector<16x32xf32>
    %c0_44 = arith.constant 0 : index
    %c0_45 = arith.constant 0 : index
    %c0_46 = arith.constant 0 : index
    %c0_47 = arith.constant 0 : index
    %72 = vector.load %arg2[%c0_44, %c0_45, %c0_46, %c0_47] : memref<1x2x16x2xf32, #tpu.memory_space<vmem>>, vector<1x1x16x2xf32>
    %73 = vector.shape_cast %72 : vector<1x1x16x2xf32> to vector<16x2xf32>
    %cst_48 = arith.constant dense<0.000000e+00> : vector<16x32xf32>
    %74 = tpu.matmul %73, %4, %cst_48 {dimension_numbers = #tpu.dot_dimension_numbers<[1], [0], [0], [1], [0, 0, 1, 1], [], []>} : vector<16x2xf32>, vector<2x32xf32>, vector<16x32xf32> -> vector<16x32xf32>
    %c0_49 = arith.constant 0 : index
    %c1_50 = arith.constant 1 : index
    %c0_51 = arith.constant 0 : index
    %c0_52 = arith.constant 0 : index
    %75 = vector.load %arg2[%c0_49, %c1_50, %c0_51, %c0_52] : memref<1x2x16x2xf32, #tpu.memory_space<vmem>>, vector<1x1x16x2xf32>
    %76 = vector.shape_cast %75 : vector<1x1x16x2xf32> to vector<16x2xf32>
    %cst_53 = arith.constant dense<0.000000e+00> : vector<16x32xf32>
    %77 = tpu.matmul %76, %4, %cst_53 {dimension_numbers = #tpu.dot_dimension_numbers<[1], [0], [0], [1], [0, 0, 1, 1], [], []>} : vector<16x2xf32>, vector<2x32xf32>, vector<16x32xf32> -> vector<16x32xf32>
    %cst_54 = arith.constant 1.000000e+00 : f32
    %78 = vector.broadcast %cst_54 : f32 to vector<16x32xf32>
    %79 = arith.addf %78, %74 : vector<16x32xf32>
    %80 = arith.mulf %71, %79 : vector<16x32xf32>
    %81 = arith.addf %80, %77 : vector<16x32xf32>
    %c0_55 = arith.constant 0 : index
    %c0_56 = arith.constant 0 : index
    %82 = vector.load %arg9[%c0_55, %c0_56] : memref<16x1xf32, #tpu.memory_space<vmem>>, vector<16x1xf32>
    %c0_57 = arith.constant 0 : index
    %c0_58 = arith.constant 0 : index
    %83 = vector.load %arg10[%c0_57, %c0_58] : memref<16x1xf32, #tpu.memory_space<vmem>>, vector<16x1xf32>
    %cst_59 = arith.constant dense<0.000000e+00> : vector<16x2xf32>
    %84 = tpu.matmul %81, %3, %cst_59 {dimension_numbers = #tpu.dot_dimension_numbers<[1], [0], [0], [1], [0, 0, 1, 1], [], []>} : vector<16x32xf32>, vector<32x2xf32>, vector<16x2xf32> -> vector<16x2xf32>
    %85 = arith.mulf %81, %81 : vector<16x32xf32>
    %cst_60 = arith.constant dense<0.000000e+00> : vector<16x2xf32>
    %86 = tpu.matmul %85, %3, %cst_60 {dimension_numbers = #tpu.dot_dimension_numbers<[1], [0], [0], [1], [0, 0, 1, 1], [], []>} : vector<16x32xf32>, vector<32x2xf32>, vector<16x2xf32> -> vector<16x2xf32>
    %cst_61 = arith.constant dense<0.000000e+00> : vector<8x2xf32>
    %87 = tpu.matmul %1, %84, %cst_61 {dimension_numbers = #tpu.dot_dimension_numbers<[1], [0], [0], [1], [0, 0, 1, 1], [], []>} : vector<8x16xf32>, vector<16x2xf32>, vector<8x2xf32> -> vector<8x2xf32>
    %cst_62 = arith.constant dense<0.000000e+00> : vector<16x2xf32>
    %88 = tpu.matmul %2, %87, %cst_62 {dimension_numbers = #tpu.dot_dimension_numbers<[1], [0], [0], [1], [0, 0, 1, 1], [], []>} : vector<16x8xf32>, vector<8x2xf32>, vector<16x2xf32> -> vector<16x2xf32>
    %cst_63 = arith.constant 3.125000e-02 : f32
    %89 = vector.broadcast %cst_63 : f32 to vector<16x2xf32>
    %90 = arith.mulf %88, %89 : vector<16x2xf32>
    %cst_64 = arith.constant dense<0.000000e+00> : vector<8x2xf32>
    %91 = tpu.matmul %1, %86, %cst_64 {dimension_numbers = #tpu.dot_dimension_numbers<[1], [0], [0], [1], [0, 0, 1, 1], [], []>} : vector<8x16xf32>, vector<16x2xf32>, vector<8x2xf32> -> vector<8x2xf32>
    %cst_65 = arith.constant dense<0.000000e+00> : vector<16x2xf32>
    %92 = tpu.matmul %2, %91, %cst_65 {dimension_numbers = #tpu.dot_dimension_numbers<[1], [0], [0], [1], [0, 0, 1, 1], [], []>} : vector<16x8xf32>, vector<8x2xf32>, vector<16x2xf32> -> vector<16x2xf32>
    %cst_66 = arith.constant 3.125000e-02 : f32
    %93 = vector.broadcast %cst_66 : f32 to vector<16x2xf32>
    %94 = arith.mulf %92, %93 : vector<16x2xf32>
    %95 = arith.mulf %90, %90 : vector<16x2xf32>
    %96 = arith.subf %94, %95 : vector<16x2xf32>
    %cst_67 = arith.constant 0.000000e+00 : f32
    %97 = vector.broadcast %cst_67 : f32 to vector<16x2xf32>
    %98 = arith.maximumf %96, %97 : vector<16x2xf32>
    %cst_68 = arith.constant 9.99999974E-6 : f32
    %99 = vector.broadcast %cst_68 : f32 to vector<16x2xf32>
    %100 = arith.addf %98, %99 : vector<16x2xf32>
    %101 = math.rsqrt %100 : vector<16x2xf32>
    %102 = vector.broadcast %82 : vector<16x1xf32> to vector<16x2xf32>
    %103 = arith.mulf %101, %102 : vector<16x2xf32>
    %104 = arith.mulf %90, %103 : vector<16x2xf32>
    %105 = vector.broadcast %83 : vector<16x1xf32> to vector<16x2xf32>
    %106 = arith.subf %105, %104 : vector<16x2xf32>
    %cst_69 = arith.constant dense<0.000000e+00> : vector<16x32xf32>
    %107 = tpu.matmul %103, %4, %cst_69 {dimension_numbers = #tpu.dot_dimension_numbers<[1], [0], [0], [1], [0, 0, 1, 1], [], []>} : vector<16x2xf32>, vector<2x32xf32>, vector<16x32xf32> -> vector<16x32xf32>
    %108 = arith.mulf %81, %107 : vector<16x32xf32>
    %cst_70 = arith.constant dense<0.000000e+00> : vector<16x32xf32>
    %109 = tpu.matmul %106, %4, %cst_70 {dimension_numbers = #tpu.dot_dimension_numbers<[1], [0], [0], [1], [0, 0, 1, 1], [], []>} : vector<16x2xf32>, vector<2x32xf32>, vector<16x32xf32> -> vector<16x32xf32>
    %110 = arith.addf %108, %109 : vector<16x32xf32>
    %cst_71 = arith.constant 5.000000e-01 : f32
    %111 = vector.broadcast %cst_71 : f32 to vector<16x32xf32>
    %112 = arith.mulf %111, %110 : vector<16x32xf32>
    %cst_72 = arith.constant 4.471500e-02 : f32
    %113 = vector.broadcast %cst_72 : f32 to vector<16x32xf32>
    %114 = arith.mulf %113, %110 : vector<16x32xf32>
    %115 = arith.mulf %114, %110 : vector<16x32xf32>
    %116 = arith.mulf %115, %110 : vector<16x32xf32>
    %117 = arith.addf %110, %116 : vector<16x32xf32>
    %cst_73 = arith.constant 0.797884583 : f32
    %118 = vector.broadcast %cst_73 : f32 to vector<16x32xf32>
    %119 = arith.mulf %118, %117 : vector<16x32xf32>
    %120 = math.tanh %119 : vector<16x32xf32>
    %cst_74 = arith.constant 1.000000e+00 : f32
    %121 = vector.broadcast %cst_74 : f32 to vector<16x32xf32>
    %122 = arith.addf %121, %120 : vector<16x32xf32>
    %123 = arith.mulf %112, %122 : vector<16x32xf32>
    %c1_i32_75 = arith.constant 1 : i32
    %124 = tpu.dynamic_rotate %123 by %c1_i32_75 dim 1 : vector<16x32xf32>, i32 -> vector<16x32xf32>
    %125 = vector.broadcast %5 : vector<1x32xf32> to vector<16x32xf32>
    %126 = arith.mulf %124, %125 : vector<16x32xf32>
    %127 = arith.truncf %126 : vector<16x32xf32> to vector<16x32xbf16>
    %c31_i32_76 = arith.constant 31 : i32
    %128 = tpu.dynamic_rotate %123 by %c31_i32_76 dim 1 : vector<16x32xf32>, i32 -> vector<16x32xf32>
    %129 = vector.broadcast %6 : vector<1x32xf32> to vector<16x32xf32>
    %130 = arith.mulf %128, %129 : vector<16x32xf32>
    %131 = arith.truncf %130 : vector<16x32xf32> to vector<16x32xbf16>
    %132 = arith.truncf %123 : vector<16x32xf32> to vector<16x32xbf16>
    %c0_77 = arith.constant 0 : index
    %c0_78 = arith.constant 0 : index
    %c0_79 = arith.constant 0 : index
    %133 = vector.load %arg5[%c0_77, %c0_78, %c0_79] : memref<3x16x16xbf16, #tpu.memory_space<vmem>>, vector<1x16x16xbf16>
    %134 = vector.shape_cast %133 : vector<1x16x16xbf16> to vector<16x16xbf16>
    %cst_80 = arith.constant dense<0.000000e+00> : vector<16x32xf32>
    %135 = tpu.matmul %134, %127, %cst_80 {dimension_numbers = #tpu.dot_dimension_numbers<[1], [0], [0], [1], [0, 0, 1, 1], [], []>} : vector<16x16xbf16>, vector<16x32xbf16>, vector<16x32xf32> -> vector<16x32xf32>
    %c1_81 = arith.constant 1 : index
    %c0_82 = arith.constant 0 : index
    %c0_83 = arith.constant 0 : index
    %136 = vector.load %arg5[%c1_81, %c0_82, %c0_83] : memref<3x16x16xbf16, #tpu.memory_space<vmem>>, vector<1x16x16xbf16>
    %137 = vector.shape_cast %136 : vector<1x16x16xbf16> to vector<16x16xbf16>
    %cst_84 = arith.constant dense<0.000000e+00> : vector<16x32xf32>
    %138 = tpu.matmul %137, %132, %cst_84 {dimension_numbers = #tpu.dot_dimension_numbers<[1], [0], [0], [1], [0, 0, 1, 1], [], []>} : vector<16x16xbf16>, vector<16x32xbf16>, vector<16x32xf32> -> vector<16x32xf32>
    %139 = arith.addf %135, %138 : vector<16x32xf32>
    %c2_85 = arith.constant 2 : index
    %c0_86 = arith.constant 0 : index
    %c0_87 = arith.constant 0 : index
    %140 = vector.load %arg5[%c2_85, %c0_86, %c0_87] : memref<3x16x16xbf16, #tpu.memory_space<vmem>>, vector<1x16x16xbf16>
    %141 = vector.shape_cast %140 : vector<1x16x16xbf16> to vector<16x16xbf16>
    %cst_88 = arith.constant dense<0.000000e+00> : vector<16x32xf32>
    %142 = tpu.matmul %141, %131, %cst_88 {dimension_numbers = #tpu.dot_dimension_numbers<[1], [0], [0], [1], [0, 0, 1, 1], [], []>} : vector<16x16xbf16>, vector<16x32xbf16>, vector<16x32xf32> -> vector<16x32xf32>
    %143 = arith.addf %139, %142 : vector<16x32xf32>
    %c0_89 = arith.constant 0 : index
    %c0_90 = arith.constant 0 : index
    %144 = vector.load %arg6[%c0_89, %c0_90] : memref<16x1xf32, #tpu.memory_space<vmem>>, vector<16x1xf32>
    %145 = vector.broadcast %144 : vector<16x1xf32> to vector<16x32xf32>
    %146 = arith.addf %143, %145 : vector<16x32xf32>
    %c0_91 = arith.constant 0 : index
    %c0_92 = arith.constant 0 : index
    %147 = vector.load %arg1[%c0_91, %c0_92] : memref<16x32xf32, #tpu.memory_space<vmem>>, vector<16x32xf32>
    %148 = arith.addf %147, %146 : vector<16x32xf32>
    %c0_93 = arith.constant 0 : index
    %c0_94 = arith.constant 0 : index
    %149 = vector.load %arg17[%c0_93, %c0_94] : memref<16x32xf32, #tpu.memory_space<vmem>>, vector<16x32xf32>
    tpu.vector_store %arg17[%c0_93, %c0_94], %148 {strides = array<i32>} : memref<16x32xf32, #tpu.memory_space<vmem>>, vector<16x32xf32>,
    return
  }
  func.func @transform_0(%arg0: i32) -> (i32, i32) {
    %c0_i32 = arith.constant 0 : i32
    %c0_i32_0 = arith.constant 0 : i32
    return %c0_i32, %arg0 : i32, i32
  }
  func.func @transform_1(%arg0: i32) -> (i32, i32, i32, i32) {
    %c0_i32 = arith.constant 0 : i32
    %c0_i32_0 = arith.constant 0 : i32
    %c0_i32_1 = arith.constant 0 : i32
    %c0_i32_2 = arith.constant 0 : i32
    return %arg0, %c0_i32, %c0_i32_0, %c0_i32_1 : i32, i32, i32, i32
  }
  func.func @transform_2(%arg0: i32) -> (i32, i32, i32) {
    %c0_i32 = arith.constant 0 : i32
    %c0_i32_0 = arith.constant 0 : i32
    %c0_i32_1 = arith.constant 0 : i32
    %c0_i32_2 = arith.constant 0 : i32
    return %c0_i32, %c0_i32_0, %c0_i32_1 : i32, i32, i32
  }
  func.func @transform_3(%arg0: i32) -> (i32, i32) {
    %c0_i32 = arith.constant 0 : i32
    %c0_i32_0 = arith.constant 0 : i32
    %c0_i32_1 = arith.constant 0 : i32
    return %c0_i32, %c0_i32_0 : i32, i32
  }
  func.func @transform_4(%arg0: i32) -> (i32, i32, i32) {
    %c0_i32 = arith.constant 0 : i32
    %c0_i32_0 = arith.constant 0 : i32
    %c0_i32_1 = arith.constant 0 : i32
    %c0_i32_2 = arith.constant 0 : i32
    return %c0_i32, %c0_i32_0, %c0_i32_1 : i32, i32, i32
  }
  func.func @transform_5(%arg0: i32) -> (i32, i32) {
    %c0_i32 = arith.constant 0 : i32
    %c0_i32_0 = arith.constant 0 : i32
    %c0_i32_1 = arith.constant 0 : i32
    return %c0_i32, %c0_i32_0 : i32, i32
  }
  func.func @transform_6(%arg0: i32) -> (i32, i32) {
    %c0_i32 = arith.constant 0 : i32
    %c0_i32_0 = arith.constant 0 : i32
    %c0_i32_1 = arith.constant 0 : i32
    return %c0_i32, %c0_i32_0 : i32, i32
  }
  func.func @transform_7(%arg0: i32) -> (i32, i32) {
    %c0_i32 = arith.constant 0 : i32
    %c0_i32_0 = arith.constant 0 : i32
    %c0_i32_1 = arith.constant 0 : i32
    return %c0_i32, %c0_i32_0 : i32, i32
  }
  func.func @transform_8(%arg0: i32) -> (i32, i32) {
    %c0_i32 = arith.constant 0 : i32
    %c0_i32_0 = arith.constant 0 : i32
    %c0_i32_1 = arith.constant 0 : i32
    return %c0_i32, %c0_i32_0 : i32, i32
  }
  func.func @transform_9(%arg0: i32) -> (i32, i32) {
    %c0_i32 = arith.constant 0 : i32
    %c0_i32_0 = arith.constant 0 : i32
    %c0_i32_1 = arith.constant 0 : i32
    return %c0_i32, %c0_i32_0 : i32, i32
  }
  func.func @transform_10(%arg0: i32) -> (i32, i32) {
    %c0_i32 = arith.constant 0 : i32
    %c0_i32_0 = arith.constant 0 : i32
    %c0_i32_1 = arith.constant 0 : i32
    return %c0_i32, %c0_i32_0 : i32, i32
  }
  func.func @transform_11(%arg0: i32) -> (i32, i32) {
    %c0_i32 = arith.constant 0 : i32
    %c0_i32_0 = arith.constant 0 : i32
    %c0_i32_1 = arith.constant 0 : i32
    return %c0_i32, %c0_i32_0 : i32, i32
  }
  func.func @transform_12(%arg0: i32) -> (i32, i32) {
    %c0_i32 = arith.constant 0 : i32
    %c0_i32_0 = arith.constant 0 : i32
    %c0_i32_1 = arith.constant 0 : i32
    return %c0_i32, %c0_i32_0 : i32, i32
  }
  func.func @transform_13(%arg0: i32) -> (i32, i32) {
    %c0_i32 = arith.constant 0 : i32
    %c0_i32_0 = arith.constant 0 : i32
    %c0_i32_1 = arith.constant 0 : i32
    return %c0_i32, %c0_i32_0 : i32, i32
  }
  func.func @transform_14(%arg0: i32) -> (i32, i32) {
    %c0_i32 = arith.constant 0 : i32
    %c0_i32_0 = arith.constant 0 : i32
    %c0_i32_1 = arith.constant 0 : i32
    return %c0_i32, %c0_i32_0 : i32, i32
  }
  func.func @transform_15(%arg0: i32) -> (i32, i32) {
    %c0_i32 = arith.constant 0 : i32
    %c0_i32_0 = arith.constant 0 : i32
    %c0_i32_1 = arith.constant 0 : i32
    return %c0_i32, %c0_i32_0 : i32, i32
  }
  func.func @transform_16(%arg0: i32) -> (i32, i32) {
    %c0_i32 = arith.constant 0 : i32
    %c0_i32_0 = arith.constant 0 : i32
    return %c0_i32, %arg0 : i32, i32
  }
}

</mosaic_0001>

<bundles_post_ra>
// kernel: tpu_custom_call.1
= control target key start
LH: loop header
LB: loop body
LE: loop exit
PB: predicated region body
PF: predicated region fallthrough
CT: control target
= control target key end

     0   :  { %s2824_s0 = inlined_call_operand.vmem [shape: f32[16,32], index: 0, kind: input, shape index: {}]   ;;  %s2825_s1 = inlined_call_operand.vmem [shape: f32[1,2,16,2], index: 1, kind: input, shape index: {}]   ;;  %s2826_s2 = inlined_call_operand.vmem [shape: bf16[3,16,16], index: 2, kind: input, shape index: {}]   ;;  %s2827_s3 = inlined_call_operand.vmem [shape: f32[16,1], index: 3, kind: input, shape index: {}]   ;;  %s2828_s4 = inlined_call_operand.vmem [shape: bf16[3,16,16], index: 4, kind: input, shape index: {}]   ;;  %s2829_s5 = inlined_call_operand.vmem [shape: f32[16,1], index: 5, kind: input, shape index: {}]   ;;  %s2830_s6 = inlined_call_operand.vmem [shape: f32[16,1], index: 6, kind: input, shape index: {}]   ;;  %s2831_s7 = inlined_call_operand.vmem [shape: f32[16,1], index: 7, kind: input, shape index: {}]   ;;  %s2832_s8 = inlined_call_operand.vmem [shape: f32[16,1], index: 8, kind: input, shape index: {}]   ;;  %s2833_s9 = inlined_call_operand.vmem [shape: f32[16,1], index: 9, kind: input, shape index: {}]   ;;  %s2834_s10 = inlined_call_operand.vmem [shape: f32[8,16], index: 10, kind: input, shape index: {}]   ;;  %s2835_s11 = inlined_call_operand.vmem [shape: f32[16,8], index: 11, kind: input, shape index: {}]   ;;  %s2836_s12 = inlined_call_operand.vmem [shape: f32[32,2], index: 12, kind: input, shape index: {}]   ;;  %s2837_s13 = inlined_call_operand.vmem [shape: f32[2,32], index: 13, kind: input, shape index: {}]   ;;  %s2838_s14 = inlined_call_operand.vmem [shape: f32[1,32], index: 14, kind: input, shape index: {}]   ;;  %s2839_s15 = inlined_call_operand.vmem [shape: f32[1,32], index: 15, kind: input, shape index: {}]   ;;  %s2840_s16 = inlined_call_operand.hbm [shape: f32[16,32], index: 16, kind: output, shape index: {}]  }
   0x1   :  { %2842 = sst [smem:[#allocation5_spill]] %s2824_s0 }
   0x2   :  { %v2506_v0 = vld [vmem:[%s2836_s12 + $0x18] sm:$0xff]  ;;  %v2511_v1 = vld [vmem:[%s2836_s12 + $0x10] sm:$0xff]  ;;  %v2518_v2 = vld [vmem:[%s2836_s12 + $0x8] sm:$0xff]  ;;  %s2843_s29 = sld [smem:[#allocation5_spill]]  ;;  %vm71_vm0 = vcmask 261120  }
   0x3   :  { %2192 = vmatprep.subr.mxu0 %v2506_v0  ;;  %2203 = vmatprep.subr.mxu1 %v2506_v0  ;;  %v2530_v4 = vld [vmem:[%s2836_s12] sm:$0xff] }
   0x4   :  { %2193 = vmatpush3.msra.mxu0 %v2506_v0  ;;  %2204 = vmatpush3.msra.mxu1 %v2506_v0 }
   0x5   :  { %2194 = vmatprep.subr.mxu0 %v2511_v1  ;;  %2205 = vmatprep.subr.mxu1 %v2511_v1 }
   0x6   :  { %2195 = vmatpush3.msra.mxu0 %v2511_v1  ;;  %2206 = vmatpush3.msra.mxu1 %v2511_v1 }
   0x7   :  { %2196 = vmatprep.subr.mxu0 %v2518_v2  ;;  %2207 = vmatprep.subr.mxu1 %v2518_v2 }
   0x8   :  { %v2523_v3 = vld [vmem:[%s2843_s29] sm:$0xff]  ;;  %v2535_v5 = vld [vmem:[%s2843_s29 + $0x8] sm:$0xff]  ;;  %2197 = vmatpush3.msra.mxu0 %v2518_v2 }
   0x9   :  { %2200 = vmatprep.mubr.msk.f32.mxu0 %vm71_vm0, %v2523_v3  ;;  %v153_v6 = vmul.f32 %v2523_v3, %v2523_v3 }
   0xa   :  { %21 = vsyncpa [#allocation3], 0  ;;  %2198 = vmatprep.subr.mxu0 %v2530_v4  ;;  %2208 = vmatpush3.msra.mxu1 %v2518_v2  ;;  %v154_v7 = vmul.f32 %v2535_v5, %v2535_v5  ;;  %v2407_v8 = vmov 0.0   ;;  %vm2408_vm1 = vmmov 0   ;;  %v2565_v10 = vld [vmem:[%s2834_s10] sm:$0xff]  ;;  %vm236_vm2 = vcmask 130048  }
   0xb   :  { %2199 = vmatpush3.msra.mxu0 %v2530_v4  ;;  %2209 = vmatprep.subr.mxu1 %v2530_v4  ;;  %v2579_v14 = vld [vmem:[%s2835_s11] sm:$0xff]  ;;  %vm310_vm3 = vcmask 64512   ;;  %v2409_v17 = vmov 0   ;;  %v68_v18 = vld [vmem:[%s2830_s6 + $0x8] sm:$0xff]  ;;  %vm584_vm4 = vcmask 1041408   ;;  %vm577_vm5 = vcmask 15360  }
   0xc   :  { %2201 = vmatmul.mubr.msk.f32.vlgmr.msra.gmra.mxu0 %vm71_vm0, %v2535_v5  ;;  %2210 = vmatpush3.msra.mxu1 %v2530_v4  ;;  %v67_v15 = vld [vmem:[%s2830_s6] sm:$0xff]  ;;  %v70_v19 = vld [vmem:[%s2831_s7 + $0x8] sm:$0xff]  ;;  %vm766_vm6 = vcmask 1047808   ;;  %s2411_s12 = smov 1   ;;  %s2412_s19 = smov 31  }
   0xd   :  { %2211 = vmatprep.mubr.msk.f32.mxu1 %vm71_vm0, %v153_v6  ;;  %2214 = vmatprep.subr.mxu0 %v2407_v8  ;;  %v69_v16 = vld [vmem:[%s2831_s7] sm:$0xff]  ;;  %v2598_v21 = vld [vmem:[%s2835_s11 + $0x8] sm:$0xff]  ;;  %s2410_s11 = smov 32   ;;  %s2414_s22 = smov 97  }
   0xe   :  { %2212 = vmatmul.mubr.msk.f32.vlgmr.msra.gmra.mxu1 %vm71_vm0, %v154_v7  ;;  %2218 = vmatprep.mubr.msk.f32.mxu0 %vm2408_vm1, %v2407_v8  ;;  %v2609_v25 = vld [vmem:[%s2837_s13] sm:$0x3] }
   0xf   :  { %2223 = vmatprep.mubr.msk.f32.mxu1 %vm310_vm3, %v2579_v14  ;;  %2361 = vset.pattern.permute.xlu0 %v2409_v17 }
  0x10   :  { %2362 = vset.pattern.permute.xlu1 %v2409_v17  ;;  %553 = vperm.xlu0 %2361, %v67_v15  }
  0x11   :  { %567 = vperm.xlu1 %2362, %v69_v16  }
  0x14   :  { %558 = vperm.xlu0 %2361, %v68_v18  }
  0x15   :  { %572 = vperm.xlu1 %2362, %v70_v19  }
  0x8b   :  { %v554_v42 = vpop.permute.xlu0 %553 }
  0x8c   :  { %v568_v44 = vpop.permute.xlu1 %567 }
  0x8f   :  { %v559_v43 = vpop.permute.xlu0 %558 }
  0x90   :  { %v573_v51 = vpop.permute.xlu1 %572 }
  0xcc   :  { %v2202_v9 = vpop.f32.mrf.mxu0 }
  0xcd   :  { %2215 = vmatpush3.msra.mxu0 %v2202_v9 }
  0xce   :  { %v144_v11 = vpop.f32.mrf.mxu0  ;;  %v2213_v12 = vpop.f32.mrf.mxu1  ;;  %2216 = vmatprep.subr.mxu0 %v2407_v8 }
  0xcf   :  { %2217 = vmatpush3.msra.mxu0 %v144_v11 }
  0xd0   :  { %2219 = vmatmul.mubr.msk.f32.vlgmr.msra.gmra.mxu0 %vm236_vm2, %v2565_v10  ;;  %2226 = vmatprep.subr.mxu0 %v2407_v8  ;;  %v227_v13 = vpop.f32.mrf.mxu1 }
  0xd1   :  { %2227 = vmatpush3.msra.mxu0 %v2213_v12  ;;  %2230 = vmatprep.mubr.msk.f32.mxu0 %vm2408_vm1, %v2407_v8 }
  0xd2   :  { %2228 = vmatprep.subr.mxu0 %v2407_v8 }
  0xd3   :  { %2229 = vmatpush3.msra.mxu0 %v227_v13 }
  0xd4   :  { %2231 = vmatmul.mubr.msk.f32.vlgmr.msra.gmra.mxu0 %vm236_vm2, %v2565_v10  ;;  %2238 = vmatprep.subr.msk.mxu0 %vm584_vm4, %v2609_v25 }
  0xd5   :  { %2239 = vmatpush3.msk.msra.mxu0 %vm584_vm4, %v2609_v25 }
  0xd6   :  { %2248 = vmatprep.subr.bf16.mxu0 %v2407_v8 }
 0x190   :  { %v306_v20 = vpop.f32.mrf.mxu0 }
 0x191   :  { %2221 = vmatprep.subr.mxu1 %v306_v20 }
 0x192   :  { %v2220_v22 = vpop.f32.mrf.mxu0  ;;  %2222 = vmatpush3.msra.mxu1 %v306_v20 }
 0x193   :  { %2224 = vmatmul.mubr.msk.f32.vlgmr.msra.gmra.mxu1 %vm310_vm3, %v2598_v21 }
 0x194   :  { %v460_v23 = vpop.f32.mrf.mxu0  ;;  %2235 = vmatprep.mubr.msk.f32.mxu1 %vm310_vm3, %v2579_v14 }
 0x195   :  { %2233 = vmatprep.subr.mxu1 %v460_v23 }
 0x196   :  { %v2232_v24 = vpop.f32.mrf.mxu0  ;;  %2234 = vmatpush3.msra.mxu1 %v460_v23 }
 0x197   :  { %2236 = vmatmul.mubr.msk.f32.vlgmr.msra.gmra.mxu1 %vm310_vm3, %v2598_v21  ;;  %2243 = vmatprep.subr.msk.mxu1 %vm584_vm4, %v2609_v25 }
 0x198   :  { %2244 = vmatpush3.msk.msra.mxu1 %vm584_vm4, %v2609_v25 }
 0x199   :  { %2254 = vmatprep.subr.bf16.mxu1 %v2407_v8 }
 0x253   :  { %v2225_v26 = vpop.f32.mrf.mxu1 }
 0x254   :  { %v393_v27 = vmul.f32 0.03125, %v2225_v26 }
 0x255   :  { %v383_v28 = vpop.f32.mrf.mxu1 }
 0x256   :  { %v392_v29 = vmul.f32 0.03125, %v383_v28  ;;  %v542_v31 = vmul.f32 %v393_v27, %v393_v27 }
 0x257   :  { %v2237_v30 = vpop.f32.mrf.mxu1 }
 0x258   :  { %v540_v32 = vmul.f32 0.03125, %v2237_v30  ;;  %v541_v34 = vmul.f32 %v392_v29, %v392_v29 }
 0x259   :  { %v530_v33 = vpop.f32.mrf.mxu1 }
 0x25a   :  { %v544_v35 = vsub.f32 %v540_v32, %v542_v31  ;;  %v539_v36 = vmul.f32 0.03125, %v530_v33  ;;  %v2069_v32 = vld [vmem:[%s2839_s15] ss:$0 sm:$0xff] }
 0x25b   :  { %v2068_v33 = vld [vmem:[%s2838_s14] ss:$0 sm:$0xff]  ;;  %s2413_s14 = smov 127  }
 0x25c   :  { %v546_v37 = vmax.f32 %v544_v35, 0.0  ;;  %v543_v38 = vsub.f32 %v539_v36, %v541_v34  ;;  %v2363_v34 = vld [vmem:[%s2826_s2 + $0x8] sm:$0xff]  }
 0x25e   :  { %v548_v39 = vadd.f32 1e-05, %v546_v37  ;;  %v545_v40 = vmax.f32 %v543_v38, 0.0 }
 0x260   :  { %2369 = vrsqrt.f32 %v548_v39  ;;  %v547_v41 = vadd.f32 1e-05, %v545_v40 }
 0x262   :  { %2371 = vrsqrt.f32 %v547_v41 }
 0x26d   :  { %v2370_v45 = vpop.eup %2369 }
 0x26e   :  { %v562_v46 = vmul.f32 %v2370_v45, %v559_v43 }
 0x26f   :  { %v2372_v47 = vpop.eup %2371 }
 0x270   :  { %v561_v48 = vmul.f32 %v2372_v47, %v554_v42  ;;  %v564_v49 = vmul.f32 %v562_v46, %v393_v27  ;;  %v968_v47 = vld [vmem:[%s2827_s3 + $0x8] sm:$0xff] }
 0x272   :  { %v563_v50 = vmul.f32 %v561_v48, %v392_v29  ;;  %2240 = vmatprep.mubr.msk.f32.mxu0 %vm577_vm5, %v561_v48  ;;  %v576_v53 = vsub.f32 %v573_v51, %v564_v49  ;;  %v967_v48 = vld [vmem:[%s2827_s3] sm:$0xff]  ;;  %v1153_v49 = vld [vmem:[%s2832_s8 + $0x8] sm:$0xff] }
 0x273   :  { %2241 = vmatmul.mubr.msk.f32.vlgmr.msra.gmra.mxu0 %vm577_vm5, %v562_v46  ;;  %v1155_v51 = vld [vmem:[%s2833_s9 + $0x8] sm:$0xff] }
 0x274   :  { %v575_v52 = vsub.f32 %v568_v44, %v563_v50  ;;  %2250 = vmatprep.mubr.msk.bf16.mxu0 %vm2408_vm1, %v2407_v8  ;;  %v1152_v50 = vld [vmem:[%s2832_s8] sm:$0xff] }
 0x276   :  { %2245 = vmatprep.mubr.msk.f32.mxu1 %vm577_vm5, %v575_v52  ;;  %v1154_v52 = vld [vmem:[%s2833_s9] sm:$0xff] }
 0x277   :  { %2246 = vmatmul.mubr.msk.f32.vlgmr.msra.gmra.mxu1 %vm577_vm5, %v576_v53 }
 0x278   :  { %2256 = vmatprep.mubr.msk.bf16.mxu1 %vm2408_vm1, %v2407_v8 }
 0x333   :  { %v2242_v54 = vpop.f32.mrf.mxu0 }
 0x334   :  { %v664_v56 = vmul.f32 %v2242_v54, %v2535_v5  ;;  %v2365_v54 = vld [vmem:[%s2826_s2 + $0x10] sm:$0xff]  }
 0x335   :  { %v654_v55 = vpop.f32.mrf.mxu0 }
 0x336   :  { %v663_v58 = vmul.f32 %v654_v55, %v2523_v3 }
 0x337   :  { %v2247_v57 = vpop.f32.mrf.mxu1 }
 0x338   :  { %v747_v59 = vadd.f32 %v2247_v57, %v664_v56  ;;  %v2364_v56 = vld [vmem:[%s2826_s2] sm:$0xff]   ;;  %v2080_v57 = vld [vmem:[%s2825_s1 + $0x10] sm:$0xff] }
 0x339   :  { %v737_v60 = vpop.f32.mrf.mxu1 }
 0x33a   :  { %v751_v61 = vmul.f32 0.044715, %v747_v59  ;;  %v746_v62 = vadd.f32 %v737_v60, %v663_v58  ;;  %v749_v18 = vmul.f32 0.5, %v747_v59  ;;  %v2081_v58 = vld [vmem:[%s2825_s1 + $0x18] sm:$0xff]  ;;  %v982_v60 = vld [vmem:[%s2825_s1 + $0x8] sm:$0xff] }
 0x33c   :  { %v753_v63 = vmul.f32 %v751_v61, %v747_v59  ;;  %v750_v6 = vmul.f32 0.044715, %v746_v62  ;;  %v748_v23 = vmul.f32 0.5, %v746_v62 }
 0x33e   :  { %v755_v7 = vmul.f32 %v753_v63, %v747_v59  ;;  %v752_v9 = vmul.f32 %v750_v6, %v746_v62 }
 0x340   :  { %v757_v11 = vadd.f32 %v755_v7, %v747_v59  ;;  %v754_v12 = vmul.f32 %v752_v9, %v746_v62  ;;  %v981_v59 = vld [vmem:[%s2825_s1] sm:$0xff] }
 0x342   :  { %v756_v13 = vadd.f32 %v754_v12, %v746_v62  ;;  %v759_v15 = vmul.f32 0.7978846, %v757_v11 }
 0x344   :  { %2373 = vtanh.f32 %v759_v15  ;;  %v758_v16 = vmul.f32 0.7978846, %v756_v13 }
 0x346   :  { %2375 = vtanh.f32 %v758_v16 }
 0x351   :  { %v2374_v17 = vpop.eup %2373 }
 0x352   :  { %v763_v19 = vadd.f32 1.0, %v2374_v17 }
 0x353   :  { %v2376_v20 = vpop.eup %2375 }
 0x354   :  { %v765_v22 = vmul.f32 %v763_v19, %v749_v18  ;;  %v762_v24 = vadd.f32 1.0, %v2376_v20 }
 0x356   :  { %770 = vrot.lane.b32.xlu1 %v765_v22, %s2410_s11  ;;  %v764_v26 = vmul.f32 %v762_v24, %v748_v23 }
 0x358   :  { %767 = vrot.lane.b32.xlu0 %v764_v26, %s2410_s11  ;;  %v801_v27 = vpack.c.bf16 %v765_v22, %v764_v26 }
 0x35a   :  { %2249 = vmatpush3.bf16.msra.mxu0 %v801_v27 }
 0x35b   :  { %2260 = vmatprep.subr.bf16.mxu0 %v2407_v8 }
 0x35d   :  { %2251 = vmatmul.mubr.msk.bf16.vlgmr.msra.gmra.mxu0 %vm236_vm2, %v2363_v34 }
 0x35e   :  { %2262 = vmatprep.mubr.msk.bf16.mxu0 %vm2408_vm1, %v2407_v8 }
 0x3c8   :  { %v771_v28 = vpop.permute.xlu1 %770 }
 0x3c9   :  { %v772_v29 = vsel %vm766_vm6, %v771_v28, %v765_v22 }
 0x3ca   :  { %775 = vrot.lane.b32.xlu1 %v772_v29, %s2410_s11  ;;  %v768_v30 = vpop.permute.xlu0 %767 }
 0x3cb   :  { %v769_v31 = vsel %vm766_vm6, %v768_v30, %v764_v26 }
 0x3cc   :  { %773 = vrot.lane.b32.xlu0 %v769_v31, %s2410_s11 }
 0x3ce   :  { %795 = vrot.lane.b32.xlu1 %v2069_v32, %s2411_s12 }
 0x3d0   :  { %784 = vrot.lane.b32.xlu0 %v2068_v33, %s2412_s19 }
 0x41d   :  { %v849_v61 = vpop.f32.mrf.mxu0 }
 0x41f   :  { %v2252_v62 = vpop.f32.mrf.mxu0 }
 0x421   :  { %v852_v63 = vpop.f32.mrf.mxu0 }
 0x423   :  { %v2253_v6 = vpop.f32.mrf.mxu0 }
 0x43c   :  { %v776_v35 = vpop.permute.xlu1 %775 }
 0x43d   :  { %v778_v38 = vsel %vm766_vm6, %v776_v35, %v765_v22 }
 0x43e   :  { %v774_v36 = vpop.permute.xlu0 %773 }
 0x43f   :  { %v777_v37 = vsel %vm766_vm6, %v774_v36, %v764_v26 }
 0x440   :  { %v2652_v39 = vpop.permute.xlu1 %795 }
 0x441   :  { %v798_v40 = vmul.f32 %v2652_v39, %v777_v37  ;;  %v799_v41 = vmul.f32 %v2652_v39, %v778_v38 }
 0x442   :  { %v2656_v42 = vpop.permute.xlu0 %784 }
 0x443   :  { %v787_v43 = vmul.f32 %v2656_v42, %v777_v37  ;;  %v788_v44 = vmul.f32 %v2656_v42, %v778_v38  ;;  %v800_v45 = vpack.c.bf16 %v799_v41, %v798_v40 }
 0x445   :  { %918 = vrot.lane.b32.xlu1 %v800_v45, %s2413_s14  ;;  %v789_v46 = vpack.c.bf16 %v788_v44, %v787_v43 }
 0x447   :  { %862 = vrot.lane.b32.xlu0 %v789_v46, %s2414_s22 }
 0x449   :  { %976 = vperm.xlu1 %2362, %v968_v47  }
 0x44b   :  { %971 = vperm.xlu0 %2361, %v967_v48  }
 0x44d   :  { %1631 = vperm.xlu1 %2362, %v1153_v49  }
 0x44f   :  { %1626 = vperm.xlu0 %2361, %v1152_v50  }
 0x451   :  { %1645 = vperm.xlu1 %2362, %v1155_v51  }
 0x453   :  { %1640 = vperm.xlu0 %2361, %v1154_v52  }
 0x4b7   :  { %v919_v53 = vpop.permute.xlu1 %918 }
 0x4b8   :  { %2261 = vmatpush3.bf16.msra.mxu0 %v919_v53 }
 0x4b9   :  { %v863_v55 = vpop.permute.xlu0 %862  ;;  %2276 = vmatprep.subr.mxu0 %v2506_v0 }
 0x4ba   :  { %2255 = vmatpush3.bf16.msra.mxu1 %v863_v55 }
 0x4bb   :  { %2263 = vmatmul.mubr.msk.bf16.vlgmr.msra.gmra.mxu0 %vm236_vm2, %v2365_v54  ;;  %2266 = vmatprep.subr.msk.mxu1 %vm584_vm4, %v2609_v25 }
 0x4bc   :  { %2277 = vmatpush3.msra.mxu0 %v2506_v0 }
 0x4bd   :  { %2257 = vmatmul.mubr.msk.bf16.vlgmr.msra.gmra.mxu1 %vm236_vm2, %v2364_v56  ;;  %2278 = vmatprep.subr.mxu0 %v2511_v1 }
 0x4be   :  { %2267 = vmatpush3.msk.msra.mxu1 %vm584_vm4, %v2609_v25  ;;  %2268 = vmatprep.mubr.msk.f32.mxu1 %vm577_vm5, %v2080_v57 }
 0x4bf   :  { %2271 = vmatprep.subr.msk.mxu1 %vm584_vm4, %v2609_v25  ;;  %2279 = vmatpush3.msra.mxu0 %v2511_v1 }
 0x4c0   :  { %2280 = vmatprep.subr.mxu0 %v2518_v2 }
 0x4c1   :  { %2281 = vmatpush3.msra.mxu0 %v2518_v2 }
 0x4c2   :  { %2282 = vmatprep.subr.mxu0 %v2530_v4 }
 0x4c3   :  { %2283 = vmatpush3.msra.mxu0 %v2530_v4 }
 0x4c4   :  { %2298 = vmatprep.subr.mxu0 %v2407_v8  ;;  %v977_v20 = vpop.permute.xlu1 %976 }
 0x4c5   :  { %2269 = vmatmul.mubr.msk.f32.vlgmr.msra.gmra.mxu1 %vm577_vm5, %v2081_v58 }
 0x4c6   :  { %2272 = vmatpush3.msk.msra.mxu1 %vm584_vm4, %v2609_v25  ;;  %2273 = vmatprep.mubr.msk.f32.mxu1 %vm577_vm5, %v981_v59  ;;  %v972_v26 = vpop.permute.xlu0 %971 }
 0x4c7   :  { %2287 = vmatprep.subr.mxu1 %v2506_v0 }
 0x4c8   :  { %v1632_v59 = vpop.permute.xlu1 %1631 }
 0x4c9   :  { %2274 = vmatmul.mubr.msk.f32.vlgmr.msra.gmra.mxu1 %vm577_vm5, %v982_v60 }
 0x4ca   :  { %2288 = vmatpush3.msra.mxu1 %v2506_v0  ;;  %v1627_v60 = vpop.permute.xlu0 %1626 }
 0x4cb   :  { %2289 = vmatprep.subr.mxu1 %v2511_v1 }
 0x4cc   :  { %2290 = vmatpush3.msra.mxu1 %v2511_v1 }
 0x4cd   :  { %2291 = vmatprep.subr.mxu1 %v2518_v2 }
 0x4ce   :  { %2292 = vmatpush3.msra.mxu1 %v2518_v2 }
 0x4cf   :  { %2293 = vmatprep.subr.mxu1 %v2530_v4 }
 0x4d0   :  { %2294 = vmatpush3.msra.mxu1 %v2530_v4 }
 0x4d1   :  { %2310 = vmatprep.subr.mxu1 %v2407_v8 }
 0x57b   :  { %v958_v7 = vpop.f32.mrf.mxu0 }
 0x57d   :  { %v902_v0 = vpop.f32.mrf.mxu1  ;;  %v2264_v9 = vpop.f32.mrf.mxu0 }
 0x57e   :  { %v903_v2 = vadd.f32 %v902_v0, %v849_v61  ;;  %v1641_v0 = vpop.permute.xlu0 %1640  ;;  %v1646_v9 = vpop.permute.xlu1 %1645 }
 0x57f   :  { %v2258_v11 = vpop.f32.mrf.mxu1  ;;  %v961_v12 = vpop.f32.mrf.mxu0 }
 0x580   :  { %v965_v4 = vadd.f32 %v958_v7, %v903_v2 }
 0x581   :  { %v905_v1 = vpop.f32.mrf.mxu1  ;;  %v2265_v13 = vpop.f32.mrf.mxu0 }
 0x582   :  { %v906_v15 = vadd.f32 %v905_v1, %v852_v63  ;;  %v979_v28 = vadd.f32 %v972_v26, %v965_v4 }
 0x583   :  { %v2259_v16 = vpop.f32.mrf.mxu1 }
 0x584   :  { %v966_v18 = vadd.f32 %v961_v12, %v906_v15 }
 0x585   :  { %v2270_v17 = vpop.f32.mrf.mxu1 }
 0x586   :  { %v980_v23 = vadd.f32 %v977_v20, %v966_v18 }
 0x587   :  { %v1058_v19 = vpop.f32.mrf.mxu1 }
 0x589   :  { %v2275_v22 = vpop.f32.mrf.mxu1 }
 0x58a   :  { %v1145_v24 = vadd.f32 1.0, %v2275_v22 }
 0x58b   :  { %v1139_v27 = vpop.f32.mrf.mxu1 }
 0x58c   :  { %v1149_v29 = vmul.f32 %v1145_v24, %v980_v23  ;;  %v1140_v30 = vadd.f32 1.0, %v1139_v27 }
 0x58e   :  { %v1148_v31 = vmul.f32 %v1140_v30, %v979_v28  ;;  %v2730_v32 = vadd.f32 %v2270_v17, %v1149_v29 }
 0x590   :  { %v2732_v33 = vadd.f32 %v1148_v31, %v1058_v19  ;;  %v1238_v35 = vmul.f32 %v2730_v32, %v2730_v32 }
 0x592   :  { %2284 = vmatprep.mubr.msk.f32.mxu0 %vm71_vm0, %v2732_v33  ;;  %v1237_v34 = vmul.f32 %v2732_v33, %v2732_v33 }
 0x593   :  { %2285 = vmatmul.mubr.msk.f32.vlgmr.msra.gmra.mxu0 %vm71_vm0, %v2730_v32 }
 0x594   :  { %2295 = vmatprep.mubr.msk.f32.mxu1 %vm71_vm0, %v1237_v34  ;;  %2302 = vmatprep.mubr.msk.f32.mxu0 %vm2408_vm1, %v2407_v8 }
 0x595   :  { %2296 = vmatmul.mubr.msk.f32.vlgmr.msra.gmra.mxu1 %vm71_vm0, %v1238_v35 }
 0x596   :  { %2314 = vmatprep.mubr.msk.f32.mxu1 %vm2408_vm1, %v2407_v8 }
 0x653   :  { %v2286_v36 = vpop.f32.mrf.mxu0 }
 0x654   :  { %2299 = vmatpush3.msra.mxu0 %v2286_v36 }
 0x655   :  { %v1228_v37 = vpop.f32.mrf.mxu0  ;;  %v2297_v38 = vpop.f32.mrf.mxu1  ;;  %2300 = vmatprep.subr.mxu0 %v2407_v8 }
 0x656   :  { %2301 = vmatpush3.msra.mxu0 %v1228_v37  ;;  %2311 = vmatpush3.msra.mxu1 %v2297_v38 }
 0x657   :  { %v1311_v40 = vpop.f32.mrf.mxu1  ;;  %2303 = vmatmul.mubr.msk.f32.vlgmr.msra.gmra.mxu0 %vm236_vm2, %v2565_v10  ;;  %2312 = vmatprep.subr.mxu1 %v2407_v8 }
 0x658   :  { %2313 = vmatpush3.msra.mxu1 %v1311_v40  ;;  %2307 = vmatprep.mubr.msk.f32.mxu0 %vm310_vm3, %v2579_v14 }
 0x659   :  { %2315 = vmatmul.mubr.msk.f32.vlgmr.msra.gmra.mxu1 %vm236_vm2, %v2565_v10  ;;  %2322 = vmatprep.subr.msk.mxu1 %vm584_vm4, %v2609_v25 }
 0x65a   :  { %2323 = vmatpush3.msk.msra.mxu1 %vm584_vm4, %v2609_v25 }
 0x65b   :  { %2332 = vmatprep.subr.bf16.mxu1 %v2407_v8 }
 0x717   :  { %v1386_v41 = vpop.f32.mrf.mxu0 }
 0x718   :  { %2305 = vmatprep.subr.mxu0 %v1386_v41 }
 0x719   :  { %v2304_v43 = vpop.f32.mrf.mxu0  ;;  %2306 = vmatpush3.msra.mxu0 %v1386_v41  ;;  %v1533_v44 = vpop.f32.mrf.mxu1 }
 0x71a   :  { %2308 = vmatmul.mubr.msk.f32.vlgmr.msra.gmra.mxu0 %vm310_vm3, %v2598_v21  ;;  %2317 = vmatprep.subr.mxu0 %v1533_v44  ;;  %v2366_v43 = vld [vmem:[%s2828_s4 + $0x8] sm:$0xff]  }
 0x71b   :  { %v2316_v45 = vpop.f32.mrf.mxu1  ;;  %2318 = vmatpush3.msra.mxu0 %v1533_v44  ;;  %2319 = vmatprep.mubr.msk.f32.mxu0 %vm310_vm3, %v2579_v14 }
 0x71c   :  { %2327 = vmatprep.subr.msk.mxu0 %vm584_vm4, %v2609_v25 }
 0x71e   :  { %2320 = vmatmul.mubr.msk.f32.vlgmr.msra.gmra.mxu0 %vm310_vm3, %v2598_v21 }
 0x71f   :  { %2328 = vmatpush3.msk.msra.mxu0 %vm584_vm4, %v2609_v25 }
 0x720   :  { %2338 = vmatprep.subr.bf16.mxu0 %v2407_v8 }
 0x7da   :  { %v2309_v10 = vpop.f32.mrf.mxu0 }
 0x7db   :  { %v1466_v46 = vmul.f32 0.03125, %v2309_v10 }
 0x7dc   :  { %v1456_v47 = vpop.f32.mrf.mxu0 }
 0x7dd   :  { %v1465_v48 = vmul.f32 0.03125, %v1456_v47  ;;  %v1615_v50 = vmul.f32 %v1466_v46, %v1466_v46 }
 0x7de   :  { %v2321_v49 = vpop.f32.mrf.mxu0 }
 0x7df   :  { %v1613_v51 = vmul.f32 0.03125, %v2321_v49  ;;  %v1614_v14 = vmul.f32 %v1465_v48, %v1465_v48 }
 0x7e0   :  { %v1603_v52 = vpop.f32.mrf.mxu0 }
 0x7e1   :  { %v1617_v53 = vsub.f32 %v1613_v51, %v1615_v50  ;;  %v1612_v54 = vmul.f32 0.03125, %v1603_v52 }
 0x7e3   :  { %v1619_v55 = vmax.f32 %v1617_v53, 0.0  ;;  %v1616_v56 = vsub.f32 %v1612_v54, %v1614_v14 }
 0x7e5   :  { %v1621_v57 = vadd.f32 1e-05, %v1619_v55  ;;  %v1618_v21 = vmax.f32 %v1616_v56, 0.0  ;;  %v2018_v55 = vld [vmem:[%s2829_s5] sm:$0xff] }
 0x7e7   :  { %2377 = vrsqrt.f32 %v1621_v57  ;;  %v1620_v58 = vadd.f32 1e-05, %v1618_v21 }
 0x7e9   :  { %2379 = vrsqrt.f32 %v1620_v58 }
 0x7f4   :  { %v2378_v25 = vpop.eup %2377 }
 0x7f5   :  { %v1635_v61 = vmul.f32 %v2378_v25, %v1632_v59  ;;  %v2367_v25 = vld [vmem:[%s2828_s4] sm:$0xff]   ;;  %v2368_v59 = vld [vmem:[%s2828_s4 + $0x10] sm:$0xff]   ;;  %s2415_s4 = smov [#allocation2]  }
 0x7f6   :  { %v2380_v62 = vpop.eup %2379 }
 0x7f7   :  { %v1634_v63 = vmul.f32 %v2380_v62, %v1627_v60  ;;  %v1637_v6 = vmul.f32 %v1635_v61, %v1466_v46 }
 0x7f9   :  { %2324 = vmatprep.mubr.msk.f32.mxu1 %vm577_vm5, %v1634_v63  ;;  %v1636_v7 = vmul.f32 %v1634_v63, %v1465_v48  ;;  %v1649_v12 = vsub.f32 %v1646_v9, %v1637_v6 }
 0x7fa   :  { %2325 = vmatmul.mubr.msk.f32.vlgmr.msra.gmra.mxu1 %vm577_vm5, %v1635_v61 }
 0x7fb   :  { %v1648_v11 = vsub.f32 %v1641_v0, %v1636_v7  ;;  %2334 = vmatprep.mubr.msk.bf16.mxu1 %vm2408_vm1, %v2407_v8 }
 0x7fd   :  { %2329 = vmatprep.mubr.msk.f32.mxu0 %vm577_vm5, %v1648_v11 }
 0x7fe   :  { %2330 = vmatmul.mubr.msk.f32.vlgmr.msra.gmra.mxu0 %vm577_vm5, %v1649_v12 }
 0x7ff   :  { %2340 = vmatprep.mubr.msk.bf16.mxu0 %vm2408_vm1, %v2407_v8 }
 0x8ba   :  { %v2326_v1 = vpop.f32.mrf.mxu1 }
 0x8bb   :  { %v1732_v15 = vmul.f32 %v2326_v1, %v2730_v32 }
 0x8bc   :  { %v1722_v13 = vpop.f32.mrf.mxu1 }
 0x8bd   :  { %v1731_v2 = vmul.f32 %v1722_v13, %v2732_v33 }
 0x8be   :  { %v2331_v16 = vpop.f32.mrf.mxu0 }
 0x8bf   :  { %v1815_v17 = vadd.f32 %v2331_v16, %v1732_v15 }
 0x8c0   :  { %v1805_v18 = vpop.f32.mrf.mxu0 }
 0x8c1   :  { %v1819_v19 = vmul.f32 0.044715, %v1815_v17  ;;  %v1814_v4 = vadd.f32 %v1805_v18, %v1731_v2  ;;  %v1817_v32 = vmul.f32 0.5, %v1815_v17 }
 0x8c3   :  { %v1821_v20 = vmul.f32 %v1819_v19, %v1815_v17  ;;  %v1818_v22 = vmul.f32 0.044715, %v1814_v4  ;;  %v1816_v36 = vmul.f32 0.5, %v1814_v4 }
 0x8c5   :  { %v1823_v23 = vmul.f32 %v1821_v20, %v1815_v17  ;;  %v1820_v24 = vmul.f32 %v1818_v22, %v1814_v4 }
 0x8c7   :  { %v1825_v26 = vadd.f32 %v1823_v23, %v1815_v17  ;;  %v1822_v27 = vmul.f32 %v1820_v24, %v1814_v4 }
 0x8c9   :  { %v1824_v28 = vadd.f32 %v1822_v27, %v1814_v4  ;;  %v1827_v29 = vmul.f32 0.7978846, %v1825_v26 }
 0x8cb   :  { %2381 = vtanh.f32 %v1827_v29  ;;  %v1826_v30 = vmul.f32 0.7978846, %v1824_v28 }
 0x8cd   :  { %2383 = vtanh.f32 %v1826_v30 }
 0x8d8   :  { %v2382_v31 = vpop.eup %2381 }
 0x8d9   :  { %v1831_v34 = vadd.f32 1.0, %v2382_v31 }
 0x8da   :  { %v2384_v35 = vpop.eup %2383 }
 0x8db   :  { %v1833_v33 = vmul.f32 %v1831_v34, %v1817_v32  ;;  %v1830_v37 = vadd.f32 1.0, %v2384_v35 }
 0x8dd   :  { %1837 = vrot.lane.b32.xlu1 %v1833_v33, %s2410_s11  ;;  %v1832_v38 = vmul.f32 %v1830_v37, %v1816_v36 }
 0x8df   :  { %1834 = vrot.lane.b32.xlu0 %v1832_v38, %s2410_s11  ;;  %v1852_v40 = vpack.c.bf16 %v1833_v33, %v1832_v38 }
 0x8e1   :  { %2333 = vmatpush3.bf16.msra.mxu1 %v1852_v40 }
 0x8e2   :  { %2344 = vmatprep.subr.bf16.mxu1 %v2407_v8 }
 0x8e4   :  { %2335 = vmatmul.mubr.msk.bf16.vlgmr.msra.gmra.mxu1 %vm236_vm2, %v2366_v43 }
 0x8e5   :  { %2346 = vmatprep.mubr.msk.bf16.mxu1 %vm2408_vm1, %v2407_v8  ;;  %v2019_v8 = vld [vmem:[%s2829_s5 + $0x8] sm:$0xff]  ;;  %s2041_s5 = sshll.u32 %s2415_s4, 4  ;;  %s2042_s5 = int_to_ptr.vmem [resolvable:$true] %s2041_s5 }
 0x8e6   :  { %s2385_s27 = scalar_lea.vmem %s2042_s5, 256  ;;  %p2390_p1 = scmp.lt.s32.totalorder %s2042_s5, %s2042_s5 }
 0x8e7   :  { %p2386_p0 = scmp.ne.s32.totalorder %s2042_s5, %s2385_s27  ;;  %p2391_p2 = scmp.lt.s32.totalorder %s2385_s27, %s2385_s27 }
 0x8e9   :  { %p2392_p3 = por %p2391_p2, %p2390_p1 }
 0x8eb   :  { %p2393_p4 = pnand %p2392_p3, %p2386_p0 }
 0x94f   :  { %v1838_v41 = vpop.permute.xlu1 %1837 }
 0x950   :  { %v1839_v44 = vsel %vm766_vm6, %v1838_v41, %v1833_v33 }
 0x951   :  { %1842 = vrot.lane.b32.xlu1 %v1839_v44, %s2410_s11  ;;  %v1835_v45 = vpop.permute.xlu0 %1834 }
 0x952   :  { %v1836_v10 = vsel %vm766_vm6, %v1835_v45, %v1832_v38 }
 0x953   :  { %1840 = vrot.lane.b32.xlu0 %v1836_v10, %s2410_s11 }
 0x9a4   :  { %v1900_v56 = vpop.f32.mrf.mxu1 }
 0x9c3   :  { %v1843_v46 = vpop.permute.xlu1 %1842 }
 0x9c4   :  { %v1845_v47 = vsel %vm766_vm6, %v1843_v46, %v1833_v33 }
 0x9c5   :  { %v1841_v48 = vpop.permute.xlu0 %1840  ;;  %v1847_v50 = vmul.f32 %v1845_v47, %v2656_v42  ;;  %v1850_v51 = vmul.f32 %v1845_v47, %v2652_v39 }
 0x9c6   :  { %v1844_v49 = vsel %vm766_vm6, %v1841_v48, %v1832_v38 }
 0x9c7   :  { %v1846_v52 = vmul.f32 %v1844_v49, %v2656_v42  ;;  %v1849_v14 = vmul.f32 %v1844_v49, %v2652_v39  ;;  %v2336_v42 = vpop.f32.mrf.mxu1 }
 0x9c9   :  { %v1851_v53 = vpack.c.bf16 %v1850_v51, %v1849_v14  ;;  %v1848_v54 = vpack.c.bf16 %v1847_v50, %v1846_v52  ;;  %v1903_v57 = vpop.f32.mrf.mxu1 }
 0x9cb   :  { %1969 = vrot.lane.b32.xlu1 %v1851_v53, %s2413_s14  ;;  %1913 = vrot.lane.b32.xlu0 %v1848_v54, %s2414_s22  ;;  %v2337_v39 = vpop.f32.mrf.mxu1 }
 0x9cf   :  { %2027 = vperm.xlu1 %2362, %v2019_v8   ;;  %2022 = vperm.xlu0 %2361, %v2018_v55  }
 0xa3d   :  { %v1970_v21 = vpop.permute.xlu1 %1969  ;;  %v1914_v58 = vpop.permute.xlu0 %1913 }
 0xa3e   :  { %2339 = vmatpush3.bf16.msra.mxu0 %v1914_v58  ;;  %2345 = vmatpush3.bf16.msra.mxu1 %v1970_v21 }
 0xa41   :  { %2341 = vmatmul.mubr.msk.bf16.vlgmr.msra.gmra.mxu0 %vm236_vm2, %v2367_v25  ;;  %2347 = vmatmul.mubr.msk.bf16.vlgmr.msra.gmra.mxu1 %vm236_vm2, %v2368_v59 }
 0xa4a   :  { %v2023_v7 = vpop.permute.xlu0 %2022  ;;  %v2028_v17 = vpop.permute.xlu1 %2027 }
 0xb01   :  { %v1953_v60 = vpop.f32.mrf.mxu0  ;;  %v2009_v61 = vpop.f32.mrf.mxu1 }
 0xb02   :  { %v1954_v62 = vadd.f32 %v1953_v60, %v1900_v56 }
 0xb03   :  { %v2342_v63 = vpop.f32.mrf.mxu0  ;;  %v2348_v6 = vpop.f32.mrf.mxu1 }
 0xb04   :  { %v2016_v0 = vadd.f32 %v2009_v61, %v1954_v62 }
 0xb05   :  { %v1956_v9 = vpop.f32.mrf.mxu0  ;;  %v2012_v11 = vpop.f32.mrf.mxu1 }
 0xb06   :  { %v2030_v12 = vadd.f32 %v2023_v7, %v2016_v0  ;;  %v1957_v1 = vadd.f32 %v1956_v9, %v1903_v57 }
 0xb07   :  { %v2343_v13 = vpop.f32.mrf.mxu0  ;;  %v2349_v15 = vpop.f32.mrf.mxu1 }
 0xb08   :  { %v2032_v16 = vadd.f32 %v2030_v12, %v2523_v3  ;;  %v2017_v2 = vadd.f32 %v2012_v11, %v1957_v1 }
 0xb0a   :  { %2034 = vst.msk [vmem:[#allocation2] sm:$0xff] %vm71_vm0, %v2032_v16  ;;  %v2031_v18 = vadd.f32 %v2028_v17, %v2017_v2 }
 0xb0c   :  { %v2033_v19 = vadd.f32 %v2031_v18, %v2535_v5 }
 0xb0e   :  { %2035 = vst.msk [vmem:[#allocation2 + $0x8] sm:$0xff] %vm71_vm0, %v2033_v19 }
 0xb0f   :  { %2396 = shalt.err (!%p2393_p4)
}
 0xb10   :  { %s2416_s28 = smov 128   ;;  %s2417_s29 = smov 8  }
 0xb11   :  { %2047 = dma.vmem_to_hbm [thread:$0]  %s2042_s5, 256, %s2840_s16, [#allocation3], %s2416_s28, %s2416_s28, %s2417_s29  }
 0xb12   :  { %2405 = dma.done.wait [#allocation3], 256  }
 0xb13   :  { %2406 = vsyncadd [#allocation3], 4294967040 }
 0xb14   :  { %2051 = vsyncpa [#allocation3], 1 }

</bundles_post_ra>
